<compile_context>
chip_gen: v7x
topology: tpu7x:2x2x1
jax: 0.10.0
libtpu: 0.0.40
codegen_flags: <defaults>
</compile_context>

<pallas_src>
import jax
import jax.numpy as jnp
from jax import lax
from jax.experimental import pallas as pl
from jax.experimental.pallas import tpu as pltpu

LANES = 128


def _round_up(x, m):
    return ((x + m - 1) // m) * m


def gcn_head_kernel(w_ref, e_ref, out_ref):
    # w_ref:   (C_pad, D)      resident weight, zero-padded rows (tiny)
    # e_ref:   (tile_n, D)     tile of node embeddings (rows)
    # out_ref: (tile_n, C_pad) lane-dense scores tile
    # Contract D on both operands -> (tile_n, C_pad). Equals weight.mm(E.T).t()
    # for this node tile, with no XLU transpose on the MXU result.
    out_ref[...] = lax.dot_general(
        e_ref[...], w_ref[...],
        dimension_numbers=(((1,), (1,)), ((), ())),
        preferred_element_type=jnp.float32,
    ).astype(out_ref.dtype)


def gcn_forward(weight, embeds_nd, *, tile_n=2048):
    """weight: (num_classes, embed_dim); embeds_nd: (num_nodes, embed_dim) rows.

    Returns (num_nodes, num_classes) == (weight @ embeds_nd.T).T, i.e. the
    PyTorch `self.weight.mm(embeds).t()`.
    """
    C, D = weight.shape
    N, D2 = embeds_nd.shape
    assert D == D2

    c_pad = _round_up(max(C, 1), LANES)              # lane-dense output width
    tile_n = max(8, min(tile_n, _round_up(N, 8)))    # sublane-aligned node tile
    n_pad = _round_up(N, tile_n)

    # Zero-pad: extra weight rows produce zero scores (sliced off below);
    # extra node rows are likewise sliced off.
    w_p = jnp.zeros((c_pad, D), weight.dtype).at[:C, :].set(weight)
    e_p = embeds_nd if n_pad == N else jnp.pad(embeds_nd, ((0, n_pad - N), (0, 0)))

    # Per-step VMEM (f32): weight c_pad*D*4 + 2x(tile_n*D*4) in
    # + 2x(tile_n*c_pad*4) out  ->  ~3 MiB at tile_n=2048, D=64.
    grid = (n_pad // tile_n,)
    out = pl.pallas_call(
        gcn_head_kernel,
        out_shape=jax.ShapeDtypeStruct((n_pad, c_pad), jnp.float32),
        grid=grid,
        in_specs=[
            pl.BlockSpec((c_pad, D), lambda i: (0, 0)),    # weight resident
            pl.BlockSpec((tile_n, D), lambda i: (i, 0)),   # node-embedding tile
        ],
        out_specs=pl.BlockSpec((tile_n, c_pad), lambda i: (i, 0)),
        compiler_params=pltpu.CompilerParams(
            dimension_semantics=("parallel",),
        ),
    )(w_p, e_p)
    return out[:N, :C]


def make_params(key, num_classes, embed_dim, num_total_nodes):
    kw, ke = jax.random.split(key)
    # xavier_uniform_ on a (num_classes, embed_dim) tensor:
    # fan_in = embed_dim, fan_out = num_classes
    bound = (6.0 / (embed_dim + num_classes)) ** 0.5
    weight = jax.random.uniform(kw, (num_classes, embed_dim),
                                dtype=jnp.float32, minval=-bound, maxval=bound)
    # Deterministic stand-in for the encoder: row-major (num_nodes, embed_dim)
    # table so the per-batch lookup is a lane-friendly row gather.
    embed_table = jax.random.normal(ke, (num_total_nodes, embed_dim),
                                    dtype=jnp.float32)
    return weight, embed_table


def enc(embed_table, nodes):
    # graphsage encoders return (embed_dim, batch); we keep rows (batch, D)
    # for the kernel and only transpose in the pure-JAX reference check.
    return embed_table[nodes, :]


if __name__ == "__main__":
    num_classes = 7       # Cora-like label count
    embed_dim = 64
    num_total_nodes = 32
    batch_nodes = 16

    key = jax.random.PRNGKey(0)
    weight, embed_table = make_params(key, num_classes, embed_dim, num_total_nodes)

    # deterministic "nodes" index vector
    nodes = jnp.arange(batch_nodes, dtype=jnp.int32)

    embeds_nd = enc(embed_table, nodes)                 # (batch_nodes, embed_dim)
    scores_t = gcn_forward(weight, embeds_nd)           # (batch_nodes, num_classes)
    scores_t = jax.block_until_ready(scores_t)

    # sanity check vs. plain-JAX reference of the PyTorch math:
    # embeds (D, N) = embeds_nd.T ; scores.t() = (weight @ embeds).T
    ref = (weight @ embeds_nd.T).T
    assert scores_t.shape == (batch_nodes, num_classes)
    assert jnp.allclose(scores_t, ref, atol=1e-5, rtol=1e-5)

    print("KERNEL_OK")
</pallas_src>

<mosaic_0001>
module attributes {stable_mosaic.version = 11 : i64} {
  func.func @gcn_head_kernel(%arg0: i32, %arg1: memref<128x64xf32, #tpu.memory_space<vmem>>, %arg2: memref<16x64xf32, #tpu.memory_space<vmem>>, %arg3: memref<16x128xf32, #tpu.memory_space<vmem>>) attributes {dimension_semantics = [#tpu.dimension_semantics<parallel>], iteration_bounds = array<i64: 1>, scalar_prefetch = 0 : i64, scratch_operands = 0 : i64, tpu.core_type = #tpu.core_type<tc>, window_params = [{pipeline_mode = #tpu.pipeline_mode<synchronous>, transform_indices = @transform_0, window_bounds = array<i64: 128, 64>}, {transform_indices = @transform_1, window_bounds = array<i64: 16, 64>}, {transform_indices = @transform_2, window_bounds = array<i64: 16, 128>}]} {
    %c0 = arith.constant 0 : index
    %c0_0 = arith.constant 0 : index
    %0 = vector.load %arg2[%c0, %c0_0] : memref<16x64xf32, #tpu.memory_space<vmem>>, vector<16x64xf32>
    %c0_1 = arith.constant 0 : index
    %c0_2 = arith.constant 0 : index
    %1 = vector.load %arg1[%c0_1, %c0_2] : memref<128x64xf32, #tpu.memory_space<vmem>>, vector<128x64xf32>
    %cst = arith.constant dense<0.000000e+00> : vector<16x128xf32>
    %2 = tpu.matmul %0, %1, %cst {dimension_numbers = #tpu.dot_dimension_numbers<[1], [1], [0], [0], [0, 0, 1, 0], [], []>} : vector<16x64xf32>, vector<128x64xf32>, vector<16x128xf32> -> vector<16x128xf32>
    %c0_3 = arith.constant 0 : index
    %c0_4 = arith.constant 0 : index
    %3 = vector.load %arg3[%c0_3, %c0_4] : memref<16x128xf32, #tpu.memory_space<vmem>>, vector<16x128xf32>
    tpu.vector_store %arg3[%c0_3, %c0_4], %2 {strides = array<i32>} : memref<16x128xf32, #tpu.memory_space<vmem>>, vector<16x128xf32>,
    return
  }
  func.func @transform_0(%arg0: i32) -> (i32, i32) {
    %c0_i32 = arith.constant 0 : i32
    %c0_i32_0 = arith.constant 0 : i32
    %c0_i32_1 = arith.constant 0 : i32
    return %c0_i32, %c0_i32_0 : i32, i32
  }
  func.func @transform_1(%arg0: i32) -> (i32, i32) {
    %c0_i32 = arith.constant 0 : i32
    %c0_i32_0 = arith.constant 0 : i32
    return %arg0, %c0_i32 : i32, i32
  }
  func.func @transform_2(%arg0: i32) -> (i32, i32) {
    %c0_i32 = arith.constant 0 : i32
    %c0_i32_0 = arith.constant 0 : i32
    return %arg0, %c0_i32 : i32, i32
  }
}

</mosaic_0001>

<bundles_post_ra>
// kernel: tpu_custom_call.1
= control target key start
LH: loop header
LB: loop body
LE: loop exit
PB: predicated region body
PF: predicated region fallthrough
CT: control target
= control target key end

     0   :  { %vm30_vm0 = vcmask 523264   ;;  %s448_s0 = inlined_call_operand.vmem [shape: f32[128,64], index: 0, kind: input, shape index: {}]   ;;  %s449_s1 = inlined_call_operand.vmem [shape: f32[16,64], index: 1, kind: input, shape index: {}]   ;;  %s450_s2 = inlined_call_operand.hbm [shape: f32[16,128], index: 2, kind: output, shape index: {}]  }
   0x1   :  { %v14_v0 = vld [vmem:[%s448_s0] sm:$0xff]  ;;  %v15_v1 = vld [vmem:[%s448_s0 + $0x8] sm:$0xff]  ;;  %v16_v2 = vld [vmem:[%s448_s0 + $0x10] sm:$0xff] }
   0x2   :  { %v249_v3 = vpack.c.bf16 %v15_v1, %v14_v0  ;;  %vm353_vm1 = vmpackc.low %vm30_vm0, %vm30_vm0  ;;  %v17_v5 = vld [vmem:[%s448_s0 + $0x18] sm:$0xff]  ;;  %v12_v7 = vld [vmem:[%s449_s1] sm:$0xff] }
   0x3   :  { %v255_v6 = vpack.c.bf16 %v17_v5, %v16_v2  ;;  %v18_v8 = vld [vmem:[%s448_s0 + $0x20] sm:$0xff]  ;;  %v19_v9 = vld [vmem:[%s448_s0 + $0x28] sm:$0xff]  ;;  %246 = vmatprep.mubr.msk.f32.mxu0 %vm30_vm0, %v12_v7 }
   0x4   :  { %251 = vmatprep.subr.msk.bf16.mxu0 %vm353_vm1, %v249_v3 }
   0x5   :  { %254 = vmatpush3.bf16.xpose.msk.msra.mxu0 %vm353_vm1, %v249_v3 }
   0x6   :  { %257 = vmatprep.subr.msk.bf16.mxu0 %vm353_vm1, %v255_v6 }
   0x7   :  { %7 = vsyncpa [#allocation3], 0  ;;  %v261_v10 = vpack.c.bf16 %v19_v9, %v18_v8  ;;  %v20_v11 = vld [vmem:[%s448_s0 + $0x30] sm:$0xff]  ;;  %v21_v12 = vld [vmem:[%s448_s0 + $0x38] sm:$0xff]  ;;  %s324_s17 = smov [#allocation2]  }
   0x8   :  { %v267_v13 = vpack.c.bf16 %v21_v12, %v20_v11  ;;  %v22_v14 = vld [vmem:[%s448_s0 + $0x40] sm:$0xff]  ;;  %v23_v15 = vld [vmem:[%s448_s0 + $0x48] sm:$0xff]  ;;  %v24_v17 = vld [vmem:[%s448_s0 + $0x50] sm:$0xff]  ;;  %s167_s18 = sshll.u32 %s324_s17, 4  ;;  %s168_s18 = int_to_ptr.vmem [resolvable:$true] %s167_s18 }
   0x9   :  { %v273_v16 = vpack.c.bf16 %v23_v15, %v22_v14  ;;  %v25_v18 = vld [vmem:[%s448_s0 + $0x58] sm:$0xff]  ;;  %v26_v20 = vld [vmem:[%s448_s0 + $0x60] sm:$0xff]  ;;  %v27_v21 = vld [vmem:[%s448_s0 + $0x68] sm:$0xff]  ;;  %p305_p1 = scmp.lt.s32.totalorder %s168_s18, %s168_s18 }
   0xa   :  { %v279_v19 = vpack.c.bf16 %v25_v18, %v24_v17  ;;  %v285_v22 = vpack.c.bf16 %v27_v21, %v26_v20  ;;  %v28_v23 = vld [vmem:[%s448_s0 + $0x70] sm:$0xff]  ;;  %v29_v24 = vld [vmem:[%s448_s0 + $0x78] sm:$0xff]  ;;  %v13_v26 = vld [vmem:[%s449_s1 + $0x8] sm:$0xff]  ;;  %s300_s0 = scalar_lea.vmem %s168_s18, 256 }
   0xb   :  { %v291_v25 = vpack.c.bf16 %v29_v24, %v28_v23  ;;  %p301_p0 = scmp.ne.s32.totalorder %s168_s18, %s300_s0  ;;  %p306_p2 = scmp.lt.s32.totalorder %s300_s0, %s300_s0 }
   0xd   :  { %260 = vmatpush3.bf16.xpose.msk.msra.mxu0 %vm353_vm1, %v255_v6  ;;  %p307_p3 = por %p306_p2, %p305_p1 }
   0xe   :  { %263 = vmatprep.subr.msk.bf16.mxu0 %vm353_vm1, %v261_v10 }
   0xf   :  { %p308_p4 = pnand %p307_p3, %p301_p0 }
  0x15   :  { %266 = vmatpush3.bf16.xpose.msk.msra.mxu0 %vm353_vm1, %v261_v10 }
  0x16   :  { %269 = vmatprep.subr.msk.bf16.mxu0 %vm353_vm1, %v267_v13 }
  0x1d   :  { %272 = vmatpush3.bf16.xpose.msk.msra.mxu0 %vm353_vm1, %v267_v13 }
  0x1e   :  { %275 = vmatprep.subr.msk.bf16.mxu0 %vm353_vm1, %v273_v16 }
  0x25   :  { %278 = vmatpush3.bf16.xpose.msk.msra.mxu0 %vm353_vm1, %v273_v16 }
  0x26   :  { %281 = vmatprep.subr.msk.bf16.mxu0 %vm353_vm1, %v279_v19 }
  0x2d   :  { %284 = vmatpush3.bf16.xpose.msk.msra.mxu0 %vm353_vm1, %v279_v19 }
  0x2e   :  { %287 = vmatprep.subr.msk.bf16.mxu0 %vm353_vm1, %v285_v22 }
  0x35   :  { %290 = vmatpush3.bf16.xpose.msk.msra.mxu0 %vm353_vm1, %v285_v22 }
  0x36   :  { %293 = vmatprep.subr.msk.bf16.mxu0 %vm353_vm1, %v291_v25 }
  0x3d   :  { %296 = vmatpush3.bf16.xpose.msk.msra.mxu0 %vm353_vm1, %v291_v25 }
  0x44   :  { %247 = vmatmul.mubr.msk.f32.vlgmr.msra.gmra.mrb[0].mxu0 %vm30_vm0, %v13_v26 }
 0x117   :  { %v248_v27 = vpop.f32.mrb[0].mxu0 }
 0x118   :  { %161 = vst [vmem:[#allocation2 + $0x8] sm:$0xff] %v248_v27  ;;  %v151_v28 = vpop.f32.mrb[1].mxu0 }
 0x119   :  { %160 = vst [vmem:[#allocation2] sm:$0xff] %v151_v28 }
 0x11a   :  { %311 = shalt.err (!%p308_p4)
}
 0x11b   :  { %s312_s1 = scalar_lea.hbm %s450_s2, 256 }
 0x11c   :  { %p313_p5 = scmp.ne.s32.totalorder %s450_s2, %s312_s1  ;;  %p316_p6 = scmp.lt.u32.totalorder %s312_s1, %s450_s2 }
 0x11e   :  { %p318_p7 = pnand %p316_p6, %p313_p5 }
 0x120   :  { %321 = shalt.err (!%p318_p7)
}
 0x121   :  { %s325_s25 = smov 128   ;;  %s326_s26 = smov 8  }
 0x122   :  { %173 = dma.vmem_to_hbm [thread:$0]  %s168_s18, 256, %s450_s2, [#allocation3], %s325_s25, %s325_s25, %s326_s26  }
 0x123   :  { %322 = dma.done.wait [#allocation3], 256  }
 0x124   :  { %323 = vsyncadd [#allocation3], 4294967040 }
 0x125   :  { %177 = vsyncpa [#allocation3], 1 }

</bundles_post_ra>
